<compile_context>
chip_gen: v6e
topology: v6e:2x2x1
jax: 0.10.0
libtpu: 0.0.40
codegen_flags: <defaults>
</compile_context>

<pallas_src>
import functools

import jax
import jax.numpy as jnp
from jax.experimental import pallas as pl
from jax.experimental.pallas import tpu as pltpu

EPS = 1e-5


# ----------------------------- kernels --------------------------------------


def _norm_kernel_lanes(x_ref, y_ref, stats_ref, *, eps, inv_t):
    """Lane-dense layout.  x_ref: [T, Lb]; stats over axis 0 (time)."""
    x = x_ref[...].astype(jnp.float32)                         # [T, Lb]
    mean = jnp.sum(x, axis=0, keepdims=True) * inv_t           # [1, Lb]
    xc = x - mean
    var = jnp.sum(xc * xc, axis=0, keepdims=True) * inv_t      # unbiased=False
    std = jnp.sqrt(var + eps)                                  # [1, Lb]
    rstd = 1.0 / std                                           # exact, tiny array
    y_ref[...] = (xc * rstd).astype(y_ref.dtype)
    stats_ref[0:1, :] = mean.astype(stats_ref.dtype)
    stats_ref[1:2, :] = std.astype(stats_ref.dtype)


def _denorm_kernel_lanes(x_ref, stats_ref, y_ref):
    """Lane-dense layout.  y = x * std + mean (broadcast over time rows)."""
    x = x_ref[...].astype(jnp.float32)                         # [T, Lb]
    mean = stats_ref[0:1, :]
    std = stats_ref[1:2, :]
    y_ref[...] = (x * std + mean).astype(y_ref.dtype)


def _norm_kernel_btc(x_ref, y_ref, stats_ref, *, eps, inv_t):
    """Natural layout (C >= 128).  x_ref: [bb, T, C]; stats over axis 1 (time)."""
    x = x_ref[...].astype(jnp.float32)                         # [bb, T, C]
    mean = jnp.sum(x, axis=1, keepdims=True) * inv_t           # [bb, 1, C]
    xc = x - mean
    var = jnp.sum(xc * xc, axis=1, keepdims=True) * inv_t
    std = jnp.sqrt(var + eps)
    rstd = 1.0 / std
    y_ref[...] = (xc * rstd).astype(y_ref.dtype)
    stats_ref[:, 0:1, :] = mean.astype(stats_ref.dtype)
    stats_ref[:, 1:2, :] = std.astype(stats_ref.dtype)


def _denorm_kernel_btc(x_ref, stats_ref, y_ref):
    x = x_ref[...].astype(jnp.float32)                         # [bb, T, C]
    mean = stats_ref[:, 0:1, :]
    std = stats_ref[:, 1:2, :]
    y_ref[...] = (x * std + mean).astype(y_ref.dtype)


# --------------------------- sizing helpers ----------------------------------


def _round_up(x, m):
    return (x + m - 1) // m * m


def _vmem_capacity_bytes():
    try:
        cap = int(getattr(pltpu.get_tpu_info(), "vmem_capacity_bytes"))
        if cap > 0:
            return cap
    except Exception:
        pass
    return 64 << 20  # conservative: v7x physical VMEM


def _budgets():
    cap = _vmem_capacity_bytes()
    block_budget = cap // 2                 # padded, double-buffered in+out + temps
    vmem_limit = int(cap * 0.9)             # leave headroom for compiler scratch
    return block_budget, vmem_limit


def _pick_lane_block(T, L, itemsize, budget):
    """Lane-tile width (multiple of 128, or full L if L <= 128) fitting VMEM."""
    if L <= 128:
        return L                            # full extent: satisfies (8,128) rule
    pT = _round_up(T, 8)
    # Per padded lane column: double-buffered in + out blocks in x dtype,
    # plus ~2 f32 temporaries (x upcast, centered x), plus the tiny stats block.
    bytes_per_lane = pT * (4 * itemsize + 2 * 4) + 2 * 8 * 4
    lb = max(128, (budget // bytes_per_lane) // 128 * 128)
    # TODO(synk): tile the time axis too if a single (T, 128) column overflows VMEM.
    if L >= 256:
        lb = min(lb, _round_up(pl.cdiv(L, 2), 128))   # >=2 grid steps (v7x megacore)
    return min(lb, max(128, (L // 128) * 128))


def _pick_batch_block(B, T, C, itemsize, budget):
    """Batch-tile size for the natural (bb, T, C) path, padding-aware."""
    pT = _round_up(T, 8)
    pC = _round_up(C, 128)
    per_row = pT * pC * (4 * itemsize + 2 * 4) + 2 * 8 * pC * 4
    bb = max(1, budget // per_row)
    if B >= 2:
        bb = min(bb, pl.cdiv(B, 2))         # >=2 grid steps (v7x megacore)
    return min(bb, B)


# ----------------------------- wrappers -------------------------------------


def revin_norm(x, eps=EPS):
    """mode='norm'. x: (B, T, C). Returns (y, state) with packed stats."""
    B, T, C = x.shape
    budget, vmem_limit = _budgets()
    cparams = pltpu.CompilerParams(dimension_semantics=("parallel",),
                                   vmem_limit_bytes=vmem_limit)
    itemsize = x.dtype.itemsize
    inv_t = float(1.0 / T)

    if C >= 128:
        bb = _pick_batch_block(B, T, C, itemsize, budget)
        grid = (pl.cdiv(B, bb),)
        kernel = functools.partial(_norm_kernel_btc, eps=float(eps), inv_t=inv_t)
        cost = pl.CostEstimate(flops=8 * B * T * C, transcendentals=2 * B * C,
                               bytes_accessed=2 * B * T * C * itemsize + 8 * B * C)
        y, stats = pl.pallas_call(
            kernel,
            out_shape=(jax.ShapeDtypeStruct((B, T, C), x.dtype),
                       jax.ShapeDtypeStruct((B, 2, C), jnp.float32)),
            grid_spec=pltpu.PrefetchScalarGridSpec(
                num_scalar_prefetch=0, grid=grid,
                in_specs=[pl.BlockSpec((bb, T, C), lambda b: (b, 0, 0))],
                out_specs=[pl.BlockSpec((bb, T, C), lambda b: (b, 0, 0)),
                           pl.BlockSpec((bb, 2, C), lambda b: (b, 0, 0))]),
            compiler_params=cparams,
            cost_estimate=cost,
        )(x)
        return y, {"layout": "btc", "stats": stats, "bc": (B, C)}

    # Lane-dense path: present the problem as (T, B*C); stats per lane column.
    L = B * C
    xt = jnp.transpose(x, (1, 0, 2)).reshape(T, L)
    lb = _pick_lane_block(T, L, itemsize, budget)
    grid = (pl.cdiv(L, lb),)
    kernel = functools.partial(_norm_kernel_lanes, eps=float(eps), inv_t=inv_t)
    cost = pl.CostEstimate(flops=8 * T * L, transcendentals=2 * L,
                           bytes_accessed=2 * T * L * itemsize + 8 * L)
    yt, stats = pl.pallas_call(
        kernel,
        out_shape=(jax.ShapeDtypeStruct((T, L), x.dtype),
                   jax.ShapeDtypeStruct((2, L), jnp.float32)),
        grid_spec=pltpu.PrefetchScalarGridSpec(
            num_scalar_prefetch=0, grid=grid,
            in_specs=[pl.BlockSpec((T, lb), lambda j: (0, j))],
            out_specs=[pl.BlockSpec((T, lb), lambda j: (0, j)),
                       pl.BlockSpec((2, lb), lambda j: (0, j))]),
        compiler_params=cparams,
        cost_estimate=cost,
    )(xt)
    y = yt.reshape(T, B, C).transpose(1, 0, 2)
    return y, {"layout": "tl", "stats": stats, "bc": (B, C)}


def revin_denorm(x, state):
    """mode='denorm'. x: (B, T, C); stats packed from a prior revin_norm."""
    B, T, C = x.shape
    budget, vmem_limit = _budgets()
    cparams = pltpu.CompilerParams(dimension_semantics=("parallel",),
                                   vmem_limit_bytes=vmem_limit)
    itemsize = x.dtype.itemsize
    stats = state["stats"]

    if state["layout"] == "btc":
        bb = _pick_batch_block(B, T, C, itemsize, budget)
        grid = (pl.cdiv(B, bb),)
        cost = pl.CostEstimate(flops=2 * B * T * C, transcendentals=0,
                               bytes_accessed=2 * B * T * C * itemsize + 8 * B * C)
        return pl.pallas_call(
            _denorm_kernel_btc,
            out_shape=jax.ShapeDtypeStruct((B, T, C), x.dtype),
            grid_spec=pltpu.PrefetchScalarGridSpec(
                num_scalar_prefetch=0, grid=grid,
                in_specs=[pl.BlockSpec((bb, T, C), lambda b: (b, 0, 0)),
                          pl.BlockSpec((bb, 2, C), lambda b: (b, 0, 0))],
                out_specs=pl.BlockSpec((bb, T, C), lambda b: (b, 0, 0))),
            compiler_params=cparams,
            cost_estimate=cost,
        )(x, stats)

    # Lane-dense path.
    L = B * C
    xt = jnp.transpose(x, (1, 0, 2)).reshape(T, L)
    lb = _pick_lane_block(T, L, itemsize, budget)
    grid = (pl.cdiv(L, lb),)
    cost = pl.CostEstimate(flops=2 * T * L, transcendentals=0,
                           bytes_accessed=2 * T * L * itemsize + 8 * L)
    yt = pl.pallas_call(
        _denorm_kernel_lanes,
        out_shape=jax.ShapeDtypeStruct((T, L), x.dtype),
        grid_spec=pltpu.PrefetchScalarGridSpec(
            num_scalar_prefetch=0, grid=grid,
            in_specs=[pl.BlockSpec((T, lb), lambda j: (0, j)),
                      pl.BlockSpec((2, lb), lambda j: (0, j))],
            out_specs=pl.BlockSpec((T, lb), lambda j: (0, j))),
        compiler_params=cparams,
        cost_estimate=cost,
    )(xt, stats)
    return yt.reshape(T, B, C).transpose(1, 0, 2)


def state_mean_std(state):
    """Unpack the stashed stats back to the module's (B, 1, C) mean / stdev."""
    B, C = state["bc"]
    stats = state["stats"]
    if state["layout"] == "btc":
        return stats[:, 0:1, :], stats[:, 1:2, :]
    return stats[0].reshape(B, 1, C), stats[1].reshape(B, 1, C)


def normalize_forward(x, mode, state=None, eps=EPS):
    """Functional equivalent of Normalize.forward (defaults: no affine)."""
    if mode == "norm":
        y, state = revin_norm(x, eps=eps)
        return y, state
    elif mode == "denorm":
        assert state is not None, "denorm requires statistics from a prior 'norm'"
        return revin_denorm(x, state), state
    else:
        raise NotImplementedError(mode)


# ------------------------------- main ---------------------------------------


if __name__ == "__main__":
    key = jax.random.PRNGKey(0)

    def check(B, T, C):
        k = jax.random.fold_in(key, C)
        x = jax.random.normal(k, (B, T, C), dtype=jnp.float32) * 3.0 + 1.5

        y, state = normalize_forward(x, "norm")
        x_rec, _ = normalize_forward(y, "denorm", state)
        jax.block_until_ready((y, state["stats"], x_rec))

        # pure-JAX reference of the PyTorch semantics
        ref_mean = jnp.mean(x, axis=1, keepdims=True)
        ref_std = jnp.sqrt(jnp.var(x, axis=1, keepdims=True) + EPS)  # unbiased=False
        ref_y = (x - ref_mean) / ref_std

        mean, std = state_mean_std(state)
        assert y.shape == (B, T, C)
        assert mean.shape == (B, 1, C) and std.shape == (B, 1, C)
        assert bool(jnp.all(jnp.isfinite(y)))
        assert bool(jnp.allclose(mean, ref_mean, atol=1e-5))
        assert bool(jnp.allclose(std, ref_std, atol=1e-5))
        assert bool(jnp.allclose(y, ref_y, atol=1e-5))
        assert bool(jnp.allclose(x_rec, x, atol=1e-4))

    check(2, 16, 4)      # small-channel case -> lane-dense (T, B*C) path
    check(2, 16, 128)    # wide-channel case  -> natural (bb, T, C) path
    print("KERNEL_OK")
</pallas_src>

<mosaic_0001>
module attributes {stable_mosaic.version = 11 : i64} {
  func.func @_norm_kernel_lanes(%arg0: i32, %arg1: memref<16x8xf32, #tpu.memory_space<vmem>>, %arg2: memref<16x8xf32, #tpu.memory_space<vmem>>, %arg3: memref<2x8xf32, #tpu.memory_space<vmem>>) attributes {dimension_semantics = [#tpu.dimension_semantics<parallel>], iteration_bounds = array<i64: 1>, scalar_prefetch = 0 : i64, scratch_operands = 0 : i64, tpu.core_type = #tpu.core_type<tc>, window_params = [{transform_indices = @transform_0, window_bounds = array<i64: 16, 8>}, {transform_indices = @transform_1, window_bounds = array<i64: 16, 8>}, {transform_indices = @transform_2, window_bounds = array<i64: 2, 8>}]} {
    %c0 = arith.constant 0 : index
    %c0_0 = arith.constant 0 : index
    %0 = vector.load %arg1[%c0, %c0_0] : memref<16x8xf32, #tpu.memory_space<vmem>>, vector<16x8xf32>
    %cst = arith.constant dense<0.000000e+00> : vector<8xf32>
    %1 = vector.multi_reduction <add>, %0, %cst [0] : vector<16x8xf32> to vector<8xf32>
    %2 = vector.shape_cast %1 : vector<8xf32> to vector<1x8xf32>
    %cst_1 = arith.constant 6.250000e-02 : f32
    %3 = vector.broadcast %cst_1 : f32 to vector<1x8xf32>
    %4 = arith.mulf %2, %3 : vector<1x8xf32>
    %5 = vector.broadcast %4 : vector<1x8xf32> to vector<16x8xf32>
    %6 = arith.subf %0, %5 : vector<16x8xf32>
    %7 = arith.mulf %6, %6 : vector<16x8xf32>
    %cst_2 = arith.constant dense<0.000000e+00> : vector<8xf32>
    %8 = vector.multi_reduction <add>, %7, %cst_2 [0] : vector<16x8xf32> to vector<8xf32>
    %9 = vector.shape_cast %8 : vector<8xf32> to vector<1x8xf32>
    %cst_3 = arith.constant 6.250000e-02 : f32
    %10 = vector.broadcast %cst_3 : f32 to vector<1x8xf32>
    %11 = arith.mulf %9, %10 : vector<1x8xf32>
    %cst_4 = arith.constant 9.99999974E-6 : f32
    %12 = vector.broadcast %cst_4 : f32 to vector<1x8xf32>
    %13 = arith.addf %11, %12 : vector<1x8xf32>
    %14 = math.sqrt %13 : vector<1x8xf32>
    %cst_5 = arith.constant 1.000000e+00 : f32
    %15 = vector.broadcast %cst_5 : f32 to vector<1x8xf32>
    %16 = arith.divf %15, %14 : vector<1x8xf32>
    %17 = vector.broadcast %16 : vector<1x8xf32> to vector<16x8xf32>
    %18 = arith.mulf %6, %17 : vector<16x8xf32>
    %c0_6 = arith.constant 0 : index
    %c0_7 = arith.constant 0 : index
    %19 = vector.load %arg2[%c0_6, %c0_7] : memref<16x8xf32, #tpu.memory_space<vmem>>, vector<16x8xf32>
    tpu.vector_store %arg2[%c0_6, %c0_7], %18 {strides = array<i32>} : memref<16x8xf32, #tpu.memory_space<vmem>>, vector<16x8xf32>,
    %c0_8 = arith.constant 0 : index
    %c0_9 = arith.constant 0 : index
    %20 = vector.load %arg3[%c0_8, %c0_9] : memref<2x8xf32, #tpu.memory_space<vmem>>, vector<1x8xf32>
    tpu.vector_store %arg3[%c0_8, %c0_9], %4 {strides = array<i32>} : memref<2x8xf32, #tpu.memory_space<vmem>>, vector<1x8xf32>,
    %c1 = arith.constant 1 : index
    %c0_10 = arith.constant 0 : index
    %21 = vector.load %arg3[%c1, %c0_10] : memref<2x8xf32, #tpu.memory_space<vmem>>, vector<1x8xf32>
    tpu.vector_store %arg3[%c1, %c0_10], %14 {strides = array<i32>} : memref<2x8xf32, #tpu.memory_space<vmem>>, vector<1x8xf32>,
    return
  }
  func.func @transform_0(%arg0: i32) -> (i32, i32) {
    %c0_i32 = arith.constant 0 : i32
    %c0_i32_0 = arith.constant 0 : i32
    return %c0_i32, %arg0 : i32, i32
  }
  func.func @transform_1(%arg0: i32) -> (i32, i32) {
    %c0_i32 = arith.constant 0 : i32
    %c0_i32_0 = arith.constant 0 : i32
    return %c0_i32, %arg0 : i32, i32
  }
  func.func @transform_2(%arg0: i32) -> (i32, i32) {
    %c0_i32 = arith.constant 0 : i32
    %c0_i32_0 = arith.constant 0 : i32
    return %c0_i32, %arg0 : i32, i32
  }
}

</mosaic_0001>

<bundles_post_ra>
// kernel: tpu_custom_call.1
= control target key start
LH: loop header
LB: loop body
LE: loop exit
PB: predicated region body
PF: predicated region fallthrough
CT: control target
= control target key end

     0   :  { %vm13_vm0 = vcmask 64512   ;;  %s139_s0 = inlined_call_operand.vmem [shape: f32[16,8], index: 0, kind: input, shape index: {}]   ;;  %s140_s1 = inlined_call_operand.vmem [shape: f32[16,8], index: 1, kind: output, shape index: {0}]   ;;  %s141_s2 = inlined_call_operand.hbm [shape: f32[2,8], index: 2, kind: output, shape index: {1}]  }
   0x1   :  { %v11_v0 = vld [vmem:[%s139_s0] sm:$0xff]  ;;  %v12_v1 = vld [vmem:[%s139_s0 + $0x8] sm:$0xff] }
   0x2   :  { %8 = vsyncpa [#allocation3], 0  ;;  %v14_v2 = vsel %vm13_vm0, %v11_v0, 0.0  ;;  %v15_v3 = vsel %vm13_vm0, %v12_v1, 0.0  ;;  %vm52_vm1 = vcmask 57344   ;;  %s100_s0 = smov [#allocation2]  }
   0x3   :  { %v16_v4 = vadd.f32 %v15_v3, %v14_v2  ;;  %s63_s13 = sshll.u32 %s100_s0, 4  ;;  %s64_s13 = int_to_ptr.vmem [resolvable:$true] %s63_s13 }
   0x4   :  { %s78_s14 = scalar_lea.vmem %s64_s13, 32  ;;  %p83_p1 = scmp.lt.s32.totalorder %s64_s13, %s64_s13 }
   0x5   :  { %v17_v5 = vrot.slane %v16_v4, 4  ;;  %p79_p0 = scmp.ne.s32.totalorder %s64_s13, %s78_s14  ;;  %p84_p2 = scmp.lt.s32.totalorder %s78_s14, %s78_s14 }
   0x7   :  { %v18_v6 = vadd.f32 %v17_v5, %v16_v4  ;;  %p85_p3 = por %p84_p2, %p83_p1 }
   0x9   :  { %v19_v7 = vrot.slane %v18_v6, 2  ;;  %p86_p4 = pnand %p85_p3, %p79_p0 }
   0xb   :  { %v20_v8 = vadd.f32 %v19_v7, %v18_v6 }
   0xd   :  { %v21_v9 = vrot.slane %v20_v8, 1 }
   0xf   :  { %v22_v10 = vadd.f32 %v21_v9, %v20_v8 }
  0x11   :  { %v23_v11 = vmul.f32 0.0625, %v22_v10 }
  0x13   :  { %v24_v12 = vsub.f32 %v11_v0, %v23_v11  ;;  %v25_v13 = vsub.f32 %v12_v1, %v23_v11  ;;  %53 = vst.msk [vmem:[#allocation2] sm:$0x1] %vm52_vm1, %v23_v11 }
  0x15   :  { %v26_v14 = vmul.f32 %v24_v12, %v24_v12  ;;  %v27_v15 = vmul.f32 %v25_v13, %v25_v13 }
  0x17   :  { %v28_v16 = vsel %vm13_vm0, %v26_v14, 0.0  ;;  %v29_v17 = vsel %vm13_vm0, %v27_v15, 0.0 }
  0x18   :  { %v30_v18 = vadd.f32 %v29_v17, %v28_v16 }
  0x1a   :  { %v31_v19 = vrot.slane %v30_v18, 4 }
  0x1c   :  { %v32_v20 = vadd.f32 %v31_v19, %v30_v18 }
  0x1e   :  { %v33_v21 = vrot.slane %v32_v20, 2 }
  0x20   :  { %v34_v22 = vadd.f32 %v33_v21, %v32_v20 }
  0x22   :  { %v35_v23 = vrot.slane %v34_v22, 1 }
  0x24   :  { %v36_v24 = vadd.f32 %v35_v23, %v34_v22 }
  0x26   :  { %v37_v25 = vmul.f32 0.0625, %v36_v24 }
  0x28   :  { %v38_v26 = vadd.f32 1e-05, %v37_v25 }
  0x2a   :  { %74 = vrsqrt.f32 %v38_v26  ;;  %vm41_vm2 = vcmp.eq.f32.partialorder %v38_v26, inf  ;;  %v44_v28 = vand.u32 2147483648, %v38_v26  ;;  %vm43_vm3 = vcmp.eq.f32.partialorder %v38_v26, 0.0 }
  0x37   :  { %v75_v27 = vpop.eup %74 }
  0x38   :  { %v40_v29 = vmul.f32 %v75_v27, %v38_v26 }
  0x3a   :  { %v42_v30 = vsel %vm41_vm2, %v38_v26, %v40_v29 }
  0x3b   :  { %v45_v31 = vsel %vm43_vm3, %v44_v28, %v42_v30 }
  0x3c   :  { %76 = vrcp.f32 %v45_v31  ;;  %54 = vst.msk [vmem:[#allocation2 + $0x1] sm:$0x1] %vm52_vm1, %v45_v31 }
  0x3d   :  { %89 = shalt.err (!%p86_p4)
}
  0x3e   :  { %66 = dma.vmem_to_hbm [thread:$0]  %s64_s13, 32, %s141_s2, [#allocation3]  }
  0x49   :  { %v77_v32 = vpop.eup %76 }
  0x4a   :  { %v48_v33 = vmul.f32 %v77_v32, %v24_v12  ;;  %v49_v34 = vmul.f32 %v77_v32, %v25_v13 }
  0x4c   :  { %50 = vst.msk [vmem:[%s140_s1] sm:$0xff] %vm13_vm0, %v48_v33  ;;  %51 = vst.msk [vmem:[%s140_s1 + $0x8] sm:$0xff] %vm13_vm0, %v49_v34 }
  0x4d   :  { %98 = dma.done.wait [#allocation3], 32  }
  0x4e   :  { %99 = vsyncadd [#allocation3], 4294967264 }
  0x4f   :  { %72 = vsyncpa [#allocation3], 1 }

</bundles_post_ra>
